<compile_context>
chip_gen: v7x
topology: tpu7x:2x2x1
jax: 0.10.0
libtpu: 0.0.40
codegen_flags: <defaults>
</compile_context>

<pallas_src>
import jax
import jax.numpy as jnp
from jax.experimental import pallas as pl
from jax.experimental.pallas import tpu as pltpu


def _round_up(x, m):
    return ((x + m - 1) // m) * m


def _chip_kind():
    try:
        return jax.devices()[0].device_kind.lower()
    except Exception:
        return ""


def _tuning():
    kind = _chip_kind()
    if "v7" in kind:
        # 2 TensorCores/chip, 64 MiB physical VMEM per TC (32 MiB default scoped).
        return dict(shards=2, budget=20 << 20, max_tm=2048, vmem_limit=40 << 20)
    if "v6" in kind:
        # 1 TensorCore, 128 MiB physical VMEM (32 MiB default scoped).
        return dict(shards=1, budget=24 << 20, max_tm=2048, vmem_limit=48 << 20)
    # v5e / unknown: conservative (16 MiB default scoped VMEM on v5e).
    return dict(shards=1, budget=13 << 20, max_tm=1024, vmem_limit=24 << 20)


def _lane_layout(total, last_dim):
    """Pick a lane-dense 2-D view (rows, L) of the flattened problem."""
    for lane in (512, 256, 128):
        if total % lane == 0:
            return total // lane, lane
    # TODO(synk): total not divisible by 128 (class count not lane friendly):
    # fall back to (M, C); lanes are partially masked (correct, just slower).
    return total // last_dim, last_dim


def _choose_row_tile(n_rows, n_shards, lane, in_dtypes, budget_bytes, max_tm):
    # Per tile row: double-buffered input streams + ~6 live f32 temporaries
    # the compiler materializes in VMEM for the elementwise chain.
    per_row = sum(2 * lane * jnp.dtype(d).itemsize for d in in_dtypes)
    per_row += 6 * lane * 4
    tm = max(32, int(budget_bytes) // max(per_row, 1))
    tm = min(tm, int(max_tm))
    # Never tile past what a single shard actually needs.
    shard_rows = -(-n_rows // n_shards)
    tm = min(tm, _round_up(max(1, shard_rows), 32))
    # Multiple of 32 covers f32 (8), bf16 (16) and int8 (32) sublane tiling,
    # and keeps the (tm//8, 8, C) reshape valid.
    return max(32, (tm // 32) * 32)


def _make_vfl_kernel(alpha, gamma, tm, n_inner, n_rows, needs_mask):
    alpha = float(alpha)
    gamma = float(gamma)
    g_int = int(round(gamma))
    gamma_is_int = (gamma == float(g_int)) and g_int >= 0

    def kernel(pred_ref, gt_ref, label_ref, out_ref, acc_ref):
        c = pl.program_id(0)
        i = pl.program_id(1)

        # Zero the per-shard accumulator at the start of each row shard.
        @pl.when(i == 0)
        def _():
            acc_ref[...] = jnp.zeros_like(acc_ref)

        x = pred_ref[...].astype(jnp.float32)      # logits
        z = gt_ref[...].astype(jnp.float32)        # soft targets
        lab = label_ref[...].astype(jnp.float32)   # 0/1 labels

        # One shared exponential feeds both the sigmoid and the softplus tail
        # of the numerically-stable BCE-with-logits:  e = exp(-|x|), t = 1+e.
        e = jnp.exp(-jnp.abs(x))                   # EUP
        t = 1.0 + e
        inv_t = 1.0 / t                            # exact divide (PyTorch parity)
        sig = jnp.where(x >= 0.0, 1.0, e) * inv_t  # sigmoid(x)
        softplus = jnp.log(t)                      # == log1p(e)

        if gamma_is_int:
            sig_pow = sig ** g_int                 # integer_pow -> VALU muls
        else:
            sig_pow = sig ** gamma                 # general (non-integer) gamma

        # weight = alpha * sigmoid(x)^gamma * (1 - label) + gt * label
        weight = alpha * sig_pow * (1.0 - lab) + z * lab
        # BCE with logits (PyTorch-stable form): max(x,0) - x*z + log(1+e)
        bce = jnp.maximum(x, 0.0) - x * z + softplus
        contrib = bce * weight

        if needs_mask:
            # Ragged / duplicated edge tiles: rows past the real row count get
            # zero contribution (jnp.where, so garbage/NaN rows don't leak in).
            row0 = (c * n_inner + i) * tm
            row_ids = jax.lax.broadcasted_iota(jnp.int32, contrib.shape, 0) + row0
            contrib = jnp.where(row_ids < n_rows, contrib, 0.0)

        # Sublane-group reduce: (tm, C) -> (tm//8, 8, C) -> sum over groups.
        ncols = contrib.shape[1]
        acc_ref[...] += jnp.sum(contrib.reshape(tm // 8, 8, ncols), axis=0)

        # On the last step of this shard, emit the (8, C) partial sums.
        @pl.when(i == pl.num_programs(1) - 1)
        def _():
            out_ref[...] = acc_ref[...]

    return kernel


def varifocal_loss(pred_score, gt_score, label, alpha=0.75, gamma=2.0, *, tm=None):
    assert pred_score.shape == gt_score.shape == label.shape
    total = pred_score.size
    last_dim = pred_score.shape[-1]

    # Free (row-major) reshape to a lane-dense 2-D slab; the op is purely
    # elementwise + global sum, so the class axis carries no layout meaning.
    rows, lane = _lane_layout(total, last_dim)
    pred2 = pred_score.reshape(rows, lane)
    gt2 = gt_score.reshape(rows, lane)
    lab2 = label.reshape(rows, lane)

    cfg = _tuning()
    shards = cfg["shards"]
    if tm is None:
        tm = _choose_row_tile(rows, shards, lane,
                              (pred2.dtype, gt2.dtype, lab2.dtype),
                              cfg["budget"], cfg["max_tm"])
    tm = max(32, (int(tm) // 32) * 32)

    n_blocks = pl.cdiv(rows, tm)
    n_inner = pl.cdiv(n_blocks, shards)
    # Need a row mask iff the grid covers more rows than actually exist
    # (ragged last block and/or duplicated clamped tiles on the last shard).
    needs_mask = (shards * n_inner * tm) != rows
    clamp = (shards * n_inner) != n_blocks

    def row_map(c, i):
        idx = c * n_inner + i
        if clamp:
            idx = jnp.minimum(idx, n_blocks - 1)  # duplicates are masked to 0
        return (idx, 0)

    in_spec = pl.BlockSpec((tm, lane), row_map)

    kernel = _make_vfl_kernel(alpha, gamma, tm, n_inner, rows, needs_mask)

    cost = pl.CostEstimate(
        flops=20 * int(total),
        transcendentals=2 * int(total),
        bytes_accessed=int(pred2.nbytes + gt2.nbytes + lab2.nbytes
                           + shards * 8 * lane * 4),
    )

    out = pl.pallas_call(
        kernel,
        out_shape=jax.ShapeDtypeStruct((shards * 8, lane), jnp.float32),
        grid_spec=pltpu.PrefetchScalarGridSpec(
            num_scalar_prefetch=0,
            grid=(shards, n_inner),
            in_specs=[in_spec, in_spec, in_spec],
            out_specs=pl.BlockSpec((8, lane), lambda c, i: (c, 0)),
            scratch_shapes=[pltpu.VMEM((8, lane), jnp.float32)],
        ),
        compiler_params=pltpu.CompilerParams(
            dimension_semantics=("parallel", "arbitrary"),
            vmem_limit_bytes=int(cfg["vmem_limit"]),
        ),
        cost_estimate=cost,
    )(pred2, gt2, lab2)

    # Tiny final cross-lane reduce over the (shards*8, lane) partial sums.
    return jnp.sum(out)


def varifocal_loss_ref(pred_score, gt_score, label, alpha=0.75, gamma=2.0):
    x = pred_score.astype(jnp.float32)
    z = gt_score.astype(jnp.float32)
    lab = label.astype(jnp.float32)
    weight = alpha * jax.nn.sigmoid(x) ** gamma * (1.0 - lab) + z * lab
    bce = jnp.maximum(x, 0.0) - x * z + jnp.log1p(jnp.exp(-jnp.abs(x)))
    return jnp.sum(bce * weight)


if __name__ == "__main__":
    key = jax.random.PRNGKey(0)
    k1, k2, k3 = jax.random.split(key, 3)

    # Primary test shape: (batch, anchors, classes), f32 inputs.
    B, A, C = 2, 64, 128
    pred_score = jax.random.normal(k1, (B, A, C), dtype=jnp.float32) * 2.0
    gt_score = jax.random.uniform(k2, (B, A, C), dtype=jnp.float32)
    label = (jax.random.uniform(k3, (B, A, C)) > 0.9).astype(jnp.float32)

    loss = jax.block_until_ready(varifocal_loss(pred_score, gt_score, label))
    ref = varifocal_loss_ref(pred_score, gt_score, label)
    assert jnp.allclose(loss, ref, rtol=1e-4, atol=1e-2), (loss, ref)

    # Ragged row count -> exercises the in-kernel mask (no jnp.pad copies).
    B2, A2 = 1, 37
    p2 = jax.random.normal(k1, (B2, A2, C), dtype=jnp.float32)
    g2 = jax.random.uniform(k2, (B2, A2, C), dtype=jnp.float32)
    l2 = (jax.random.uniform(k3, (B2, A2, C)) > 0.8).astype(jnp.float32)
    loss2 = jax.block_until_ready(varifocal_loss(p2, g2, l2))
    ref2 = varifocal_loss_ref(p2, g2, l2)
    assert jnp.allclose(loss2, ref2, rtol=1e-4, atol=1e-2), (loss2, ref2)

    # Narrow input dtypes (bf16 logits/targets, int8 labels) -> ~2.2x less HBM
    # traffic; the kernel upcasts to f32 internally, so semantics are unchanged.
    pred_bf = pred_score.astype(jnp.bfloat16)
    gt_bf = gt_score.astype(jnp.bfloat16)
    lab_i8 = label.astype(jnp.int8)
    loss3 = jax.block_until_ready(varifocal_loss(pred_bf, gt_bf, lab_i8))
    ref3 = varifocal_loss_ref(pred_bf, gt_bf, lab_i8)
    assert jnp.allclose(loss3, ref3, rtol=1e-3, atol=1e-1), (loss3, ref3)

    print("KERNEL_OK")
</pallas_src>

<mosaic_0001>
module attributes {stable_mosaic.version = 11 : i64} {
  func.func @kernel(%arg0: i32, %arg1: i32, %arg2: memref<32x512xf32, #tpu.memory_space<vmem>>, %arg3: memref<32x512xf32, #tpu.memory_space<vmem>>, %arg4: memref<32x512xf32, #tpu.memory_space<vmem>>, %arg5: memref<8x512xf32, #tpu.memory_space<vmem>>, %arg6: memref<8x512xf32, #tpu.memory_space<vmem>>) attributes {dimension_semantics = [#tpu.dimension_semantics<parallel>, #tpu.dimension_semantics<arbitrary>], iteration_bounds = array<i64: 1, 1>, scalar_prefetch = 0 : i64, scratch_operands = 1 : i64, tpu.core_type = #tpu.core_type<tc>, window_params = [{transform_indices = @transform_0, window_bounds = array<i64: 32, 512>}, {transform_indices = @transform_1, window_bounds = array<i64: 32, 512>}, {transform_indices = @transform_2, window_bounds = array<i64: 32, 512>}, {transform_indices = @transform_3, window_bounds = array<i64: 8, 512>}]} {
    %c0_i32 = arith.constant 0 : i32
    %0 = arith.cmpi eq, %arg1, %c0_i32 : i32
    %1 = arith.extui %0 : i1 to i32
    %c0_i32_0 = arith.constant 0 : i32
    %2 = arith.cmpi ne, %1, %c0_i32_0 : i32
    scf.if %2 {
      %cst_20 = arith.constant 0.000000e+00 : f32
      %42 = vector.broadcast %cst_20 : f32 to vector<8x512xf32>
      %c0_21 = arith.constant 0 : index
      %c0_22 = arith.constant 0 : index
      %43 = vector.load %arg6[%c0_21, %c0_22] : memref<8x512xf32, #tpu.memory_space<vmem>>, vector<8x512xf32>
      tpu.vector_store %arg6[%c0_21, %c0_22], %42 {strides = array<i32>} : memref<8x512xf32, #tpu.memory_space<vmem>>, vector<8x512xf32>,
    } else {
    }
    %c0 = arith.constant 0 : index
    %c0_1 = arith.constant 0 : index
    %3 = vector.load %arg2[%c0, %c0_1] : memref<32x512xf32, #tpu.memory_space<vmem>>, vector<32x512xf32>
    %c0_2 = arith.constant 0 : index
    %c0_3 = arith.constant 0 : index
    %4 = vector.load %arg3[%c0_2, %c0_3] : memref<32x512xf32, #tpu.memory_space<vmem>>, vector<32x512xf32>
    %c0_4 = arith.constant 0 : index
    %c0_5 = arith.constant 0 : index
    %5 = vector.load %arg4[%c0_4, %c0_5] : memref<32x512xf32, #tpu.memory_space<vmem>>, vector<32x512xf32>
    %6 = math.absf %3 : vector<32x512xf32>
    %cst = arith.constant 0.000000e+00 : f32
    %7 = vector.broadcast %cst : f32 to vector<32x512xf32>
    %8 = arith.subf %7, %6 : vector<32x512xf32>
    %9 = math.exp %8 : vector<32x512xf32>
    %cst_6 = arith.constant 1.000000e+00 : f32
    %10 = vector.broadcast %cst_6 : f32 to vector<32x512xf32>
    %11 = arith.addf %10, %9 : vector<32x512xf32>
    %cst_7 = arith.constant 1.000000e+00 : f32
    %12 = vector.broadcast %cst_7 : f32 to vector<32x512xf32>
    %13 = arith.divf %12, %11 : vector<32x512xf32>
    %cst_8 = arith.constant 0.000000e+00 : f32
    %14 = vector.broadcast %cst_8 : f32 to vector<32x512xf32>
    %15 = arith.cmpf oge, %3, %14 : vector<32x512xf32>
    %cst_9 = arith.constant 1.000000e+00 : f32
    %16 = vector.broadcast %cst_9 : f32 to vector<32x512xf32>
    %17 = arith.select %15, %16, %9 : vector<32x512xi1>, vector<32x512xf32>
    %18 = arith.mulf %17, %13 : vector<32x512xf32>
    %19 = math.log %11 : vector<32x512xf32>
    %20 = arith.mulf %18, %18 : vector<32x512xf32>
    %cst_10 = arith.constant 7.500000e-01 : f32
    %21 = vector.broadcast %cst_10 : f32 to vector<32x512xf32>
    %22 = arith.mulf %21, %20 : vector<32x512xf32>
    %cst_11 = arith.constant 1.000000e+00 : f32
    %23 = vector.broadcast %cst_11 : f32 to vector<32x512xf32>
    %24 = arith.subf %23, %5 : vector<32x512xf32>
    %25 = arith.mulf %22, %24 : vector<32x512xf32>
    %26 = arith.mulf %4, %5 : vector<32x512xf32>
    %27 = arith.addf %25, %26 : vector<32x512xf32>
    %cst_12 = arith.constant 0.000000e+00 : f32
    %28 = vector.broadcast %cst_12 : f32 to vector<32x512xf32>
    %29 = arith.maximumf %3, %28 : vector<32x512xf32>
    %30 = arith.mulf %3, %4 : vector<32x512xf32>
    %31 = arith.subf %29, %30 : vector<32x512xf32>
    %32 = arith.addf %31, %19 : vector<32x512xf32>
    %33 = arith.mulf %32, %27 : vector<32x512xf32>
    %c0_13 = arith.constant 0 : index
    %c0_14 = arith.constant 0 : index
    %34 = vector.load %arg6[%c0_13, %c0_14] : memref<8x512xf32, #tpu.memory_space<vmem>>, vector<8x512xf32>
    %35 = vector.shape_cast %33 : vector<32x512xf32> to vector<4x8x512xf32>
    %cst_15 = arith.constant dense<0.000000e+00> : vector<8x512xf32>
    %36 = vector.multi_reduction <add>, %35, %cst_15 [0] : vector<4x8x512xf32> to vector<8x512xf32>
    %37 = arith.addf %34, %36 : vector<8x512xf32>
    %c0_16 = arith.constant 0 : index
    %c0_17 = arith.constant 0 : index
    %38 = vector.load %arg6[%c0_16, %c0_17] : memref<8x512xf32, #tpu.memory_space<vmem>>, vector<8x512xf32>
    tpu.vector_store %arg6[%c0_16, %c0_17], %37 {strides = array<i32>} : memref<8x512xf32, #tpu.memory_space<vmem>>, vector<8x512xf32>,
    %c0_i32_18 = arith.constant 0 : i32
    %39 = arith.cmpi eq, %arg1, %c0_i32_18 : i32
    %40 = arith.extui %39 : i1 to i32
    %c0_i32_19 = arith.constant 0 : i32
    %41 = arith.cmpi ne, %40, %c0_i32_19 : i32
    scf.if %41 {
      %c0_20 = arith.constant 0 : index
      %c0_21 = arith.constant 0 : index
      %42 = vector.load %arg6[%c0_20, %c0_21] : memref<8x512xf32, #tpu.memory_space<vmem>>, vector<8x512xf32>
      %c0_22 = arith.constant 0 : index
      %c0_23 = arith.constant 0 : index
      %43 = vector.load %arg5[%c0_22, %c0_23] : memref<8x512xf32, #tpu.memory_space<vmem>>, vector<8x512xf32>
      tpu.vector_store %arg5[%c0_22, %c0_23], %42 {strides = array<i32>} : memref<8x512xf32, #tpu.memory_space<vmem>>, vector<8x512xf32>,
    } else {
    }
    return
  }
  func.func @transform_0(%arg0: i32, %arg1: i32) -> (i32, i32) {
    %c1_i32 = arith.constant 1 : i32
    %0 = arith.muli %arg0, %c1_i32 : i32
    %1 = arith.addi %0, %arg1 : i32
    %c0_i32 = arith.constant 0 : i32
    %c0_i32_0 = arith.constant 0 : i32
    return %1, %c0_i32 : i32, i32
  }
  func.func @transform_1(%arg0: i32, %arg1: i32) -> (i32, i32) {
    %c1_i32 = arith.constant 1 : i32
    %0 = arith.muli %arg0, %c1_i32 : i32
    %1 = arith.addi %0, %arg1 : i32
    %c0_i32 = arith.constant 0 : i32
    %c0_i32_0 = arith.constant 0 : i32
    return %1, %c0_i32 : i32, i32
  }
  func.func @transform_2(%arg0: i32, %arg1: i32) -> (i32, i32) {
    %c1_i32 = arith.constant 1 : i32
    %0 = arith.muli %arg0, %c1_i32 : i32
    %1 = arith.addi %0, %arg1 : i32
    %c0_i32 = arith.constant 0 : i32
    %c0_i32_0 = arith.constant 0 : i32
    return %1, %c0_i32 : i32, i32
  }
  func.func @transform_3(%arg0: i32, %arg1: i32) -> (i32, i32) {
    %c0_i32 = arith.constant 0 : i32
    %c0_i32_0 = arith.constant 0 : i32
    return %arg0, %c0_i32 : i32, i32
  }
}

</mosaic_0001>

<bundles_post_ra>
// kernel: tpu_custom_call.1
= control target key start
LH: loop header
LB: loop body
LE: loop exit
PB: predicated region body
PF: predicated region fallthrough
CT: control target
= control target key end

     0   :  { %8 = vsyncpa [#allocation4], 0  ;;  %s1395_s0 = inlined_call_operand.hbm [shape: f32[32,512], index: 0, kind: input, shape index: {}]   ;;  %s1396_s1 = inlined_call_operand.hbm [shape: f32[32,512], index: 1, kind: input, shape index: {}]   ;;  %s1397_s2 = inlined_call_operand.hbm [shape: f32[32,512], index: 2, kind: input, shape index: {}]   ;;  %s1398_s3 = inlined_call_operand.hbm [shape: f32[8,512], index: 3, kind: output, shape index: {}]  }
   0x1   :  { %9 = vsyncpa [#allocation7], 0 }
   0x2   :  { %10 = vsyncpa [#allocation5], 0  ;;  %s748_s12 = smov [#allocation6]   ;;  %s749_s14 = smov [#allocation3]  }
   0x3   :  { %s38_s13 = sshll.u32 %s748_s12, 4  ;;  %s21_s15 = sshll.u32 %s749_s14, 4  ;;  %s39_s13 = int_to_ptr.vmem [resolvable:$true] %s38_s13  ;;  %s774_s15 = int_to_ptr.vmem [resolvable:$true] %s21_s15 }
   0x4   :  { %s654_s18 = scalar_lea.hbm %s1396_s1, 2048 }
   0x5   :  { %p655_p0 = scmp.ne.s32.totalorder %s1396_s1, %s654_s18  ;;  %p658_p1 = scmp.lt.u32.totalorder %s654_s18, %s1396_s1 }
   0x7   :  { %p660_p2 = pnand %p658_p1, %p655_p0 }
   0x9   :  { %663 = shalt.err (!%p660_p2)
}
   0xa   :  { %s664_s23 = scalar_lea.vmem %s39_s13, 2048  ;;  %p669_p4 = scmp.lt.s32.totalorder %s39_s13, %s39_s13 }
   0xb   :  { %p665_p3 = scmp.ne.s32.totalorder %s39_s13, %s664_s23  ;;  %p670_p5 = scmp.lt.s32.totalorder %s664_s23, %s664_s23 }
   0xd   :  { %p671_p6 = por %p670_p5, %p669_p4 }
   0xf   :  { %p672_p7 = pnand %p671_p6, %p665_p3 }
  0x11   :  { %675 = shalt.err (!%p672_p7)
}
  0x12   :  { %s750_s24 = smov 512   ;;  %s751_s25 = smov 32  }
  0x13   :  { %44 = dma.hbm_to_vmem [thread:$0]  %s1396_s1, 2048, %s39_s13, [#allocation7], %s750_s24, %s750_s24, %s751_s25  }
  0x14   :  { %s676_s30 = scalar_lea.hbm %s1395_s0, 2048 }
  0x15   :  { %p677_p8 = scmp.ne.s32.totalorder %s1395_s0, %s676_s30  ;;  %p680_p9 = scmp.lt.u32.totalorder %s676_s30, %s1395_s0 }
  0x17   :  { %p682_p10 = pnand %p680_p9, %p677_p8 }
  0x19   :  { %685 = shalt.err (!%p682_p10)
}
  0x1a   :  { %s686_s8 = scalar_lea.vmem %s774_s15, 2048  ;;  %p691_p12 = scmp.lt.s32.totalorder %s774_s15, %s774_s15 }
  0x1b   :  { %p687_p11 = scmp.ne.s32.totalorder %s774_s15, %s686_s8  ;;  %p692_p13 = scmp.lt.s32.totalorder %s686_s8, %s686_s8 }
  0x1d   :  { %p693_p0 = por %p692_p13, %p691_p12 }
  0x1f   :  { %p694_p1 = pnand %p693_p0, %p687_p11 }
  0x21   :  { %697 = shalt.err (!%p694_p1)
}
  0x22   :  { %27 = dma.hbm_to_vmem [thread:$0]  %s1395_s0, 2048, %s774_s15, [#allocation4], %s750_s24, %s750_s24, %s751_s25  }
  0x23   :  { %s752_s10 = smov [#allocation8]   ;;  %s698_s14 = scalar_lea.hbm %s1397_s2, 2048 }
  0x24   :  { %s55_s11 = sshll.u32 %s752_s10, 4  ;;  %p699_p2 = scmp.ne.s32.totalorder %s1397_s2, %s698_s14  ;;  %s56_s11 = int_to_ptr.vmem [resolvable:$true] %s55_s11 }
  0x25   :  { %p702_p3 = scmp.lt.u32.totalorder %s698_s14, %s1397_s2 }
  0x27   :  { %p704_p4 = pnand %p702_p3, %p699_p2 }
  0x29   :  { %707 = shalt.err (!%p704_p4)
}
  0x2a   :  { %s708_s20 = scalar_lea.vmem %s56_s11, 2048  ;;  %p713_p6 = scmp.lt.s32.totalorder %s56_s11, %s56_s11 }
  0x2b   :  { %p709_p5 = scmp.ne.s32.totalorder %s56_s11, %s708_s20  ;;  %p714_p7 = scmp.lt.s32.totalorder %s708_s20, %s708_s20 }
  0x2d   :  { %p715_p8 = por %p714_p7, %p713_p6 }
  0x2f   :  { %p716_p9 = pnand %p715_p8, %p709_p5 }
  0x31   :  { %719 = shalt.err (!%p716_p9)
}
  0x32   :  { %61 = dma.hbm_to_vmem [thread:$0]  %s1397_s2, 2048, %s56_s11, [#allocation7], %s750_s24, %s750_s24, %s751_s25  }
  0x33   :  { %742 = dma.done.wait [#allocation4], 2048  }
  0x34   :  { %743 = vsyncadd [#allocation4], 4294965248 }
  0x35   :  { %744 = dma.done.wait [#allocation7], 4096  }
  0x36   :  { %745 = vsyncadd [#allocation7], 4294963200  ;;  %v826_v0 = vld [vmem:[#allocation3] sm:$0xff]  ;;  %v828_v1 = vld [vmem:[#allocation3 + $0x8] sm:$0xff]  ;;  %s753_s2 = smov [#allocation9]  }
  0x37   :  { %v830_v2 = vld [vmem:[#allocation3 + $0x10] sm:$0xff]  ;;  %v832_v3 = vld [vmem:[#allocation3 + $0x18] sm:$0xff]  ;;  %v834_v4 = vld [vmem:[#allocation3 + $0x20] sm:$0xff]  ;;  %v133_v6 = vand.u32 2147483647, %v826_v0  ;;  %vm245_vm0 = vcmp.ge.f32.partialorder %v826_v0, 0.0 }
  0x38   :  { %1422 = vst [vmem:[#allocation13_spill] sm:$0xff] %v832_v3  ;;  %v836_v5 = vld [vmem:[#allocation3 + $0x28] sm:$0xff]  ;;  %v134_v7 = vand.u32 2147483647, %v828_v1  ;;  %v840_v8 = vld [vmem:[#allocation3 + $0x30] sm:$0xff]  ;;  %v842_v9 = vld [vmem:[#allocation3 + $0x38] sm:$0xff] }
  0x39   :  { %1423 = vst [vmem:[#allocation14_spill] sm:$0xff] %v840_v8  ;;  %1424 = vst [vmem:[#allocation15_spill] sm:$0xff] %v842_v9  ;;  %v135_v10 = vand.u32 2147483647, %v830_v2  ;;  %v136_v11 = vand.u32 2147483647, %v832_v3 }
  0x3a   :  { %v846_v12 = vld [vmem:[#allocation3 + $0x40] sm:$0xff]  ;;  %v848_v13 = vld [vmem:[#allocation3 + $0x48] sm:$0xff]  ;;  %v137_v15 = vand.u32 2147483647, %v834_v4  ;;  %v851_v16 = vld [vmem:[#allocation3 + $0x50] sm:$0xff]  ;;  %v149_v23 = vsub.f32 0.0, %v133_v6 }
  0x3b   :  { %1425 = vst [vmem:[#allocation16_spill] sm:$0xff] %v846_v12  ;;  %1426 = vst [vmem:[#allocation17_spill] sm:$0xff] %v848_v13  ;;  %v101_v14 = vld [vmem:[#allocation6] sm:$0xff]  ;;  %v102_v17 = vld [vmem:[#allocation6 + $0x8] sm:$0xff]  ;;  %v138_v19 = vand.u32 2147483647, %v836_v5 }
  0x3c   :  { %1427 = vst [vmem:[#allocation18_spill] sm:$0xff] %v851_v16  ;;  %v103_v18 = vld [vmem:[#allocation6 + $0x10] sm:$0xff]  ;;  %v104_v20 = vld [vmem:[#allocation6 + $0x18] sm:$0xff]  ;;  %v105_v21 = vld [vmem:[#allocation6 + $0x20] sm:$0xff]  ;;  %v139_v22 = vand.u32 2147483647, %v840_v8  ;;  %v857_v30 = vmul.f32 %v101_v14, %v826_v0  ;;  %v865_v36 = vmul.f32 %v102_v17, %v828_v1 }
  0x3d   :  { %v150_v24 = vsub.f32 0.0, %v134_v7  ;;  %v106_v25 = vld [vmem:[#allocation6 + $0x28] sm:$0xff]  ;;  %v107_v26 = vld [vmem:[#allocation6 + $0x30] sm:$0xff]  ;;  %v140_v27 = vand.u32 2147483647, %v842_v9  ;;  %v151_v28 = vsub.f32 0.0, %v135_v10  ;;  %v868_v37 = vmul.f32 %v103_v18, %v830_v2 }
  0x3e   :  { %v152_v29 = vsub.f32 0.0, %v136_v11  ;;  %1428 = vst [vmem:[#allocation19_spill] sm:$0xff] %v857_v30  ;;  %v859_v31 = vld [vmem:[#allocation3 + $0x58] sm:$0xff]  ;;  %v861_v33 = vld [vmem:[#allocation6 + $0x40] sm:$0xff]  ;;  %v141_v34 = vand.u32 2147483647, %v846_v12  ;;  %v876_v42 = vmul.f32 %v104_v20, %v832_v3  ;;  %v879_v43 = vmul.f32 %v105_v21, %v834_v4 }
  0x3f   :  { %1429 = vst [vmem:[#allocation20_spill] sm:$0xff] %v859_v31  ;;  %v108_v32 = vld [vmem:[#allocation6 + $0x38] sm:$0xff]  ;;  %v153_v35 = vsub.f32 0.0, %v137_v15  ;;  %1430 = vst [vmem:[#allocation21_spill] sm:$0xff] %v865_v36  ;;  %v870_v38 = vld [vmem:[#allocation6 + $0x48] sm:$0xff]  ;;  %v154_v41 = vsub.f32 0.0, %v138_v19  ;;  %v885_v47 = vmul.f32 %v106_v25, %v836_v5  ;;  %v888_v48 = vmul.f32 %v107_v26, %v840_v8 }
  0x40   :  { %1431 = vst [vmem:[#allocation22_spill] sm:$0xff] %v868_v37  ;;  %v872_v39 = vld [vmem:[#allocation6 + $0x50] sm:$0xff]  ;;  %v142_v40 = vand.u32 2147483647, %v848_v13  ;;  %1432 = vst [vmem:[#allocation23_spill] sm:$0xff] %v876_v42  ;;  %v881_v44 = vld [vmem:[#allocation3 + $0x60] sm:$0xff]  ;;  %v898_v54 = vmul.f32 %v108_v32, %v842_v9  ;;  %v902_v55 = vmul.f32 %v861_v33, %v846_v12  ;;  %v915_v61 = vmul.f32 %v870_v38, %v848_v13 }
  0x41   :  { %1433 = vst [vmem:[#allocation24_spill] sm:$0xff] %v879_v43  ;;  %1434 = vst [vmem:[#allocation25_spill] sm:$0xff] %v881_v44  ;;  %v143_v45 = vand.u32 2147483647, %v851_v16  ;;  %v155_v46 = vsub.f32 0.0, %v139_v22  ;;  %v890_v49 = vld [vmem:[#allocation3 + $0x68] sm:$0xff]  ;;  %v919_v62 = vmul.f32 %v872_v39, %v851_v16 }
  0x42   :  { %1435 = vst [vmem:[#allocation26_spill] sm:$0xff] %v885_v47  ;;  %1436 = vst [vmem:[#allocation27_spill] sm:$0xff] %v888_v48  ;;  %v892_v50 = vld [vmem:[#allocation3 + $0x70] sm:$0xff]  ;;  %v894_v51 = vld [vmem:[#allocation8] sm:$0xff]  ;;  %v144_v52 = vand.u32 2147483647, %v859_v31 }
  0x43   :  { %1437 = vst [vmem:[#allocation28_spill] sm:$0xff] %v890_v49  ;;  %1438 = vst [vmem:[#allocation29_spill] sm:$0xff] %v892_v50  ;;  %v156_v53 = vsub.f32 0.0, %v140_v27  ;;  %v904_v56 = vld [vmem:[#allocation3 + $0x78] sm:$0xff]  ;;  %v906_v57 = vld [vmem:[#allocation8 + $0x8] sm:$0xff]  ;;  %v157_v59 = vsub.f32 0.0, %v141_v34  ;;  %v911_v60 = vmul.f32 %v894_v51, %v101_v14 }
  0x44   :  { %1439 = vst [vmem:[#allocation30_spill] sm:$0xff] %v898_v54  ;;  %1440 = vst [vmem:[#allocation31_spill] sm:$0xff] %v902_v55  ;;  %v908_v58 = vld [vmem:[#allocation8 + $0x10] sm:$0xff]  ;;  %v921_v63 = vld [vmem:[#allocation8 + $0x18] sm:$0xff]  ;;  %v145_v7 = vand.u32 2147483647, %v881_v44  ;;  %v927_v11 = vmul.f32 %v906_v57, %v102_v17 }
  0x45   :  { %1441 = vst [vmem:[#allocation32_spill] sm:$0xff] %v904_v56  ;;  %1442 = vst [vmem:[#allocation33_spill] sm:$0xff] %v911_v60  ;;  %v923_v6 = vld [vmem:[#allocation8 + $0x20] sm:$0xff]  ;;  %v158_v10 = vsub.f32 0.0, %v142_v40  ;;  %v930_v14 = vmul.f32 %v908_v58, %v103_v18  ;;  %v932_v15 = vld [vmem:[#allocation8 + $0x28] sm:$0xff]  ;;  %v159_v27 = vsub.f32 0.0, %v143_v45 }
  0x46   :  { %1443 = vst [vmem:[#allocation34_spill] sm:$0xff] %v915_v61  ;;  %1444 = vst [vmem:[#allocation35_spill] sm:$0xff] %v919_v62  ;;  %v934_v19 = vld [vmem:[#allocation8 + $0x30] sm:$0xff]  ;;  %v146_v22 = vand.u32 2147483647, %v890_v49  ;;  %v160_v34 = vsub.f32 0.0, %v144_v52  ;;  %v938_v62 = vmul.f32 %v921_v63, %v104_v20  ;;  %v943_v55 = vmul.f32 %v923_v6, %v105_v21 }
  0x47   :  { %1445 = vst [vmem:[#allocation36_spill] sm:$0xff] %v927_v11  ;;  %1446 = vst [vmem:[#allocation37_spill] sm:$0xff] %v930_v14  ;;  %v147_v61 = vand.u32 2147483647, %v892_v50  ;;  %v148_v40 = vand.u32 2147483647, %v904_v56  ;;  %v946_v48 = vmul.f32 %v932_v15, %v106_v25  ;;  %v949_v47 = vmul.f32 %v934_v19, %v107_v26 }
  0x48   :  { %1447 = vst [vmem:[#allocation38_spill] sm:$0xff] %v938_v62  ;;  %v165_v17 = vmul.f32 1.442695, %v149_v23  ;;  %1448 = vst [vmem:[#allocation39_spill] sm:$0xff] %v943_v55  ;;  %v167_v18 = vmul.f32 1.442695, %v150_v24 }
  0x49   :  { %v169_v54 = vmul.f32 1.442695, %v151_v28  ;;  %1449 = vst [vmem:[#allocation40_spill] sm:$0xff] %v946_v48  ;;  %1450 = vst [vmem:[#allocation41_spill] sm:$0xff] %v949_v47  ;;  %v951_v45 = vld [vmem:[#allocation8 + $0x38] sm:$0xff]  ;;  %v161_v20 = vsub.f32 0.0, %v145_v7 }
  0x4a   :  { %558 = vpow2.f32 %v165_v17  ;;  %v171_v52 = vmul.f32 1.442695, %v152_v29  ;;  %v173_v43 = vmul.f32 1.442695, %v153_v35  ;;  %v162_v23 = vsub.f32 0.0, %v146_v22  ;;  %v958_v25 = vld [vmem:[#allocation8 + $0x40] sm:$0xff] }
  0x4b   :  { %560 = vpow2.f32 %v167_v18  ;;  %v175_v21 = vmul.f32 1.442695, %v154_v41  ;;  %vm246_vm1 = vcmp.ge.f32.partialorder %v828_v1, 0.0  ;;  %v956_v24 = vmul.f32 %v951_v45, %v108_v32  ;;  %v1077_v48 = vld [vmem:[#allocation6 + $0x58] sm:$0xff]  ;;  %v1103_v55 = vld [vmem:[#allocation6 + $0x68] sm:$0xff]  ;;  %v1116_v62 = vld [vmem:[#allocation6 + $0x70] sm:$0xff] }
  0x4c   :  { %v163_v26 = vsub.f32 0.0, %v147_v61  ;;  %v164_v28 = vsub.f32 0.0, %v148_v40  ;;  %562 = vpow2.f32 %v169_v54  ;;  %v177_v42 = vmul.f32 1.442695, %v155_v46  ;;  %1456 = vst [vmem:[#allocation47_spill] sm:$0xff] %v1077_v48  ;;  %1460 = vst [vmem:[#allocation51_spill] sm:$0xff] %v1103_v55 }
  0x4d   :  { %1451 = vst [vmem:[#allocation42_spill] sm:$0xff] %v956_v24  ;;  %564 = vpow2.f32 %v171_v52  ;;  %v179_v7 = vmul.f32 1.442695, %v156_v53  ;;  %vm247_vm2 = vcmp.ge.f32.partialorder %v830_v2, 0.0  ;;  %v963_v29 = vmul.f32 %v958_v25, %v861_v33  ;;  %v1022_v53 = vld [vmem:[#allocation8 + $0x70] sm:$0xff]  ;;  %1462 = vst [vmem:[#allocation53_spill] sm:$0xff] %v1116_v62 }
  0x4e   :  { %566 = vpow2.f32 %v173_v43  ;;  %v181_v35 = vmul.f32 1.442695, %v157_v59  ;;  %v183_v41 = vmul.f32 1.442695, %v158_v10  ;;  %vm248_vm3 = vcmp.ge.f32.partialorder %v832_v3, 0.0  ;;  %v976_v10 = vld [vmem:[#allocation8 + $0x48] sm:$0xff] }
  0x4f   :  { %1452 = vst [vmem:[#allocation43_spill] sm:$0xff] %v963_v29  ;;  %568 = vpow2.f32 %v175_v21  ;;  %v185_v32 = vmul.f32 1.442695, %v159_v27  ;;  %v187_v22 = vmul.f32 1.442695, %v160_v34  ;;  %vm249_vm4 = vcmp.ge.f32.partialorder %v834_v4, 0.0 }
  0x50   :  { %v189_v61 = vmul.f32 1.442695, %v161_v20  ;;  %570 = vpow2.f32 %v177_v42  ;;  %v191_v54 = vmul.f32 1.442695, %v162_v23  ;;  %v193_v46 = vmul.f32 1.442695, %v163_v26 }
  0x51   :  { %v195_v40 = vmul.f32 1.442695, %v164_v28  ;;  %572 = vpow2.f32 %v179_v7  ;;  %vm250_vm5 = vcmp.ge.f32.partialorder %v836_v5, 0.0  ;;  %vm251_vm6 = vcmp.ge.f32.partialorder %v840_v8, 0.0  ;;  %v982_v20 = vld [vmem:[#allocation8 + $0x50] sm:$0xff]  ;;  %v992_v28 = vld [vmem:[#allocation8 + $0x58] sm:$0xff] }
  0x52   :  { %574 = vpow2.f32 %v181_v35  ;;  %vm252_vm7 = vcmp.ge.f32.partialorder %v842_v9, 0.0  ;;  %vm253_vm8 = vcmp.ge.f32.partialorder %v846_v12, 0.0  ;;  %vm254_vm9 = vcmp.ge.f32.partialorder %v848_v13, 0.0  ;;  %v1012_v34 = vld [vmem:[#allocation8 + $0x68] sm:$0xff]  ;;  %1453 = vst [vmem:[#allocation44_spill] sm:$0xff] %v1022_v53  ;;  %v1032_v42 = vld [vmem:[#allocation8 + $0x78] sm:$0xff] }
  0x53   :  { %576 = vpow2.f32 %v183_v41  ;;  %vm255_vm10 = vcmp.ge.f32.partialorder %v851_v16, 0.0  ;;  %vm256_vm11 = vcmp.ge.f32.partialorder %v859_v31, 0.0  ;;  %vm257_vm12 = vcmp.ge.f32.partialorder %v881_v44, 0.0  ;;  %1454 = vst [vmem:[#allocation45_spill] sm:$0xff] %v1032_v42  ;;  %v1090_v12 = vld [vmem:[#allocation6 + $0x60] sm:$0xff]  ;;  %v1129_v14 = vld [vmem:[#allocation6 + $0x78] sm:$0xff] }
  0x54   :  { %v559_v59 = vpop.eup %558  ;;  %578 = vpow2.f32 %v185_v32  ;;  %vm258_vm13 = vcmp.ge.f32.partialorder %v890_v49, 0.0  ;;  %vm259_vm14 = vcmp.ge.f32.partialorder %v892_v50, 0.0  ;;  %vm260_vm15 = vcmp.ge.f32.partialorder %v904_v56, 0.0  ;;  %1458 = vst [vmem:[#allocation49_spill] sm:$0xff] %v1090_v12  ;;  %1464 = vst [vmem:[#allocation55_spill] sm:$0xff] %v1129_v14  ;;  %s542_s21 = sshll.u32 %s753_s2, 4  ;;  %s543_s21 = int_to_ptr.vmem [resolvable:$true] %s542_s21 }
  0x55   :  { %v561_v18 = vpop.eup %560  ;;  %580 = vpow2.f32 %v187_v22  ;;  %v984_v52 = vadd.f32 1.0, %v559_v59  ;;  %v989_v23 = vsel %vm245_vm0, 1.0, %v559_v59  ;;  %v1002_v22 = vld [vmem:[#allocation8 + $0x60] sm:$0xff]  ;;  %v1075_v41 = vmul.f32 %v976_v10, %v870_v38  ;;  %s720_s22 = scalar_lea.vmem %s543_s21, 512  ;;  %p725_p11 = scmp.lt.s32.totalorder %s543_s21, %s543_s21 }
  0x56   :  { %v563_v26 = vpop.eup %562  ;;  %582 = vpow2.f32 %v189_v61  ;;  %v994_v7 = vadd.f32 1.0, %v561_v18  ;;  %v999_v35 = vsel %vm246_vm1, 1.0, %v561_v18  ;;  %v1088_v13 = vmul.f32 %v982_v20, %v872_v39  ;;  %p721_p10 = scmp.ne.s32.totalorder %s543_s21, %s720_s22  ;;  %p726_p12 = scmp.lt.s32.totalorder %s720_s22, %s720_s22 }
  0x57   :  { %v565_v32 = vpop.eup %564  ;;  %584 = vpow2.f32 %v191_v54  ;;  %v1004_v59 = vadd.f32 1.0, %v563_v26  ;;  %v1009_v61 = vsel %vm247_vm2, 1.0, %v563_v26  ;;  %1455 = vst [vmem:[#allocation46_spill] sm:$0xff] %v1075_v41  ;;  %v1101_v16 = vmul.f32 %v992_v28, %v1077_v48 }
  0x58   :  { %v567_v17 = vpop.eup %566  ;;  %586 = vpow2.f32 %v193_v46  ;;  %v1014_v18 = vadd.f32 1.0, %v565_v32  ;;  %v1019_v54 = vsel %vm248_vm3, 1.0, %v565_v32  ;;  %1457 = vst [vmem:[#allocation48_spill] sm:$0xff] %v1088_v13  ;;  %v1114_v31 = vmul.f32 %v1002_v22, %v1090_v12  ;;  %p727_p13 = por %p726_p12, %p725_p11 }
  0x59   :  { %v569_v27 = vpop.eup %568  ;;  %588 = vpow2.f32 %v195_v40  ;;  %v1024_v26 = vadd.f32 1.0, %v567_v17  ;;  %v1029_v46 = vsel %vm249_vm4, 1.0, %v567_v17  ;;  %1459 = vst [vmem:[#allocation50_spill] sm:$0xff] %v1101_v16  ;;  %v1127_v44 = vmul.f32 %v1012_v34, %v1103_v55 }
  0x5a   :  { %v571_v43 = vpop.eup %570  ;;  %v1034_v32 = vadd.f32 1.0, %v569_v27  ;;  %590 = vrcp.f32 %v984_v52  ;;  %v1039_v40 = vsel %vm250_vm5, 1.0, %v569_v27  ;;  %1461 = vst [vmem:[#allocation52_spill] sm:$0xff] %v1114_v31  ;;  %v1140_v49 = vmul.f32 %v1022_v53, %v1116_v62  ;;  %p728_p0 = pnand %p727_p13, %p721_p10 }
  0x5b   :  { %v573_v33 = vpop.eup %572  ;;  %v1042_v37 = vadd.f32 1.0, %v571_v43  ;;  %592 = vrcp.f32 %v994_v7  ;;  %v1047_v17 = vsel %vm251_vm6, 1.0, %v571_v43  ;;  %1463 = vst [vmem:[#allocation54_spill] sm:$0xff] %v1127_v44  ;;  %v1151_v44 = vmul.f32 %v1032_v42, %v1129_v14 }
  0x5c   :  { %v575_v36 = vpop.eup %574  ;;  %v1050_v30 = vadd.f32 1.0, %v573_v33  ;;  %594 = vrcp.f32 %v1004_v59  ;;  %v1055_v27 = vsel %vm252_vm7, 1.0, %v573_v33  ;;  %1465 = vst [vmem:[#allocation56_spill] sm:$0xff] %v1140_v49 }
  0x5d   :  { %v577_v29 = vpop.eup %576  ;;  %v1058_v24 = vadd.f32 1.0, %v575_v36  ;;  %596 = vrcp.f32 %v1014_v18  ;;  %v1063_v43 = vsel %vm253_vm8, 1.0, %v575_v36  ;;  %1466 = vst [vmem:[#allocation57_spill] sm:$0xff] %v1151_v44 }
  0x5e   :  { %v579_v8 = vpop.eup %578  ;;  %v1066_v47 = vadd.f32 1.0, %v577_v29  ;;  %598 = vrcp.f32 %v1024_v26  ;;  %v1071_v33 = vsel %vm254_vm9, 1.0, %v577_v29 }
  0x5f   :  { %v581_v9 = vpop.eup %580  ;;  %v1079_v36 = vadd.f32 1.0, %v579_v8  ;;  %600 = vrcp.f32 %v1034_v32  ;;  %v1084_v21 = vsel %vm255_vm10, 1.0, %v579_v8 }
  0x60   :  { %v583_v29 = vpop.eup %582  ;;  %v1092_v38 = vadd.f32 1.0, %v581_v9  ;;  %602 = vrcp.f32 %v1042_v37  ;;  %v1097_v41 = vsel %vm256_vm11, 1.0, %v581_v9 }
  0x61   :  { %v585_v8 = vpop.eup %584  ;;  %v1105_v39 = vadd.f32 1.0, %v583_v29  ;;  %604 = vrcp.f32 %v1050_v30  ;;  %v1110_v13 = vsel %vm257_vm12, 1.0, %v583_v29 }
  0x62   :  { %v587_v9 = vpop.eup %586  ;;  %v1118_v48 = vadd.f32 1.0, %v585_v8  ;;  %606 = vrcp.f32 %v1058_v24  ;;  %v1123_v16 = vsel %vm258_vm13, 1.0, %v585_v8 }
  0x63   :  { %v589_v29 = vpop.eup %588  ;;  %v1131_v12 = vadd.f32 1.0, %v587_v9  ;;  %608 = vrcp.f32 %v1066_v47  ;;  %v1136_v31 = vsel %vm259_vm14, 1.0, %v587_v9 }
  0x64   :  { %v591_v8 = vpop.eup %590  ;;  %v1142_v11 = vadd.f32 1.0, %v589_v29  ;;  %610 = vrcp.f32 %v1079_v36  ;;  %v1147_v55 = vsel %vm260_vm15, 1.0, %v589_v29 }
  0x65   :  { %v593_v50 = vpop.eup %592  ;;  %612 = vrcp.f32 %v1092_v38  ;;  %v277_v9 = vmul.f32 %v591_v8, %v989_v23 }
  0x66   :  { %v595_v60 = vpop.eup %594  ;;  %614 = vrcp.f32 %v1105_v39  ;;  %v278_v56 = vmul.f32 %v593_v50, %v999_v35 }
  0x67   :  { %v597_v14 = vpop.eup %596  ;;  %616 = vrcp.f32 %v1118_v48  ;;  %v279_v44 = vmul.f32 %v595_v60, %v1009_v61  ;;  %v325_v42 = vmul.f32 %v277_v9, %v277_v9 }
  0x68   :  { %v599_v8 = vpop.eup %598  ;;  %618 = vrcp.f32 %v1131_v12  ;;  %v280_v49 = vmul.f32 %v597_v14, %v1019_v54  ;;  %v326_v62 = vmul.f32 %v278_v56, %v278_v56 }
  0x69   :  { %v601_v35 = vpop.eup %600  ;;  %620 = vrcp.f32 %v1142_v11  ;;  %v281_v53 = vmul.f32 %v599_v8, %v1029_v46  ;;  %v327_v29 = vmul.f32 %v279_v44, %v279_v44  ;;  %v1169_v3 = vmul.f32 0.75, %v325_v42 }
  0x6a   :  { %v603_v60 = vpop.eup %602  ;;  %v282_v61 = vmul.f32 %v601_v35, %v1039_v40  ;;  %622 = vlog2.f32 %v984_v52  ;;  %v328_v9 = vmul.f32 %v280_v49, %v280_v49  ;;  %v1173_v23 = vmul.f32 0.75, %v326_v62 }
  0x6b   :  { %v605_v14 = vpop.eup %604  ;;  %v283_v56 = vmul.f32 %v603_v60, %v1047_v17  ;;  %624 = vlog2.f32 %v994_v7  ;;  %v329_v54 = vmul.f32 %v281_v53, %v281_v53  ;;  %v1177_v50 = vmul.f32 0.75, %v327_v29 }
  0x6c   :  { %v607_v46 = vpop.eup %606  ;;  %v284_v44 = vmul.f32 %v605_v14, %v1055_v27  ;;  %626 = vlog2.f32 %v1004_v59  ;;  %v330_v42 = vmul.f32 %v282_v61, %v282_v61  ;;  %v1181_v40 = vmul.f32 0.75, %v328_v9 }
  0x6d   :  { %v609_v52 = vpop.eup %608  ;;  %v285_v49 = vmul.f32 %v607_v46, %v1063_v43  ;;  %628 = vlog2.f32 %v1014_v18  ;;  %v331_v62 = vmul.f32 %v283_v56, %v283_v56  ;;  %v1185_v17 = vmul.f32 0.75, %v329_v54 }
  0x6e   :  { %v611_v7 = vpop.eup %610  ;;  %v286_v53 = vmul.f32 %v609_v52, %v1071_v33  ;;  %630 = vlog2.f32 %v1024_v26  ;;  %v332_v29 = vmul.f32 %v284_v44, %v284_v44  ;;  %v346_v27 = vmul.f32 0.75, %v330_v42 }
  0x6f   :  { %v613_v8 = vpop.eup %612  ;;  %v287_v59 = vmul.f32 %v611_v7, %v1084_v21  ;;  %632 = vlog2.f32 %v1034_v32  ;;  %v333_v35 = vmul.f32 %v285_v49, %v285_v49  ;;  %v347_v60 = vmul.f32 0.75, %v331_v62 }
  0x70   :  { %v615_v43 = vpop.eup %614  ;;  %v288_v18 = vmul.f32 %v613_v8, %v1097_v41  ;;  %634 = vlog2.f32 %v1042_v37  ;;  %v334_v61 = vmul.f32 %v286_v53, %v286_v53  ;;  %v348_v9 = vmul.f32 0.75, %v332_v29 }
  0x71   :  { %v617_v14 = vpop.eup %616  ;;  %v289_v33 = vmul.f32 %v615_v43, %v1110_v13  ;;  %636 = vlog2.f32 %v1050_v30  ;;  %v335_v26 = vmul.f32 %v287_v59, %v287_v59  ;;  %v349_v56 = vmul.f32 0.75, %v333_v35 }
  0x72   :  { %v619_v54 = vpop.eup %618  ;;  %v290_v21 = vmul.f32 %v617_v14, %v1123_v16  ;;  %638 = vlog2.f32 %v1058_v24  ;;  %v336_v32 = vmul.f32 %v288_v18, %v288_v18  ;;  %v350_v46 = vmul.f32 0.75, %v334_v61 }
  0x73   :  { %v621_v44 = vpop.eup %620  ;;  %v291_v41 = vmul.f32 %v619_v54, %v1136_v31  ;;  %640 = vlog2.f32 %v1066_v47  ;;  %v337_v37 = vmul.f32 %v289_v33, %v289_v33  ;;  %v351_v42 = vmul.f32 0.75, %v335_v26 }
  0x74   :  { %v623_v52 = vpop.eup %622  ;;  %v292_v13 = vmul.f32 %v621_v44, %v1147_v55  ;;  %642 = vlog2.f32 %v1079_v36  ;;  %v338_v30 = vmul.f32 %v290_v21, %v290_v21  ;;  %v352_v49 = vmul.f32 0.75, %v336_v32 }
  0x75   :  { %v625_v62 = vpop.eup %624  ;;  %v1201_v16 = vmul.f32 0.6931472, %v623_v52  ;;  %644 = vlog2.f32 %v1092_v38  ;;  %v339_v24 = vmul.f32 %v291_v41, %v291_v41  ;;  %v353_v7 = vmul.f32 0.75, %v337_v37 }
  0x76   :  { %v627_v53 = vpop.eup %626  ;;  %v1204_v31 = vmul.f32 0.6931472, %v625_v62  ;;  %646 = vlog2.f32 %v1105_v39  ;;  %v340_v47 = vmul.f32 %v292_v13, %v292_v13  ;;  %v354_v29 = vmul.f32 0.75, %v338_v30 }
  0x77   :  { %v629_v8 = vpop.eup %628  ;;  %v1207_v55 = vmul.f32 0.6931472, %v627_v53  ;;  %648 = vlog2.f32 %v1118_v48  ;;  %v355_v36 = vmul.f32 0.75, %v339_v24  ;;  %v1467_v59 = vsub.f32 1.0, %v894_v51  ;;  %v1483_v53 = vld [vmem:[#allocation45_spill] sm:$0xff] }
  0x78   :  { %v631_v38 = vpop.eup %630  ;;  %v1213_v43 = vmul.f32 0.6931472, %v629_v8  ;;  %650 = vlog2.f32 %v1131_v12  ;;  %v356_v18 = vmul.f32 0.75, %v340_v47  ;;  %v1468_v39 = vsub.f32 1.0, %v906_v57 }
  0x79   :  { %v373_v35 = vmul.f32 %v1467_v59, %v1169_v3  ;;  %v633_v14 = vpop.eup %632  ;;  %v1219_v33 = vmul.f32 0.6931472, %v631_v38  ;;  %652 = vlog2.f32 %v1142_v11  ;;  %v1469_v48 = vsub.f32 1.0, %v908_v58  ;;  %v1487_v59 = vld [vmem:[#allocation37_spill] sm:$0xff] }
  0x7a   :  { %v374_v61 = vmul.f32 %v1468_v39, %v1173_v23  ;;  %v1470_v3 = vsub.f32 1.0, %v921_v63  ;;  %v635_v54 = vpop.eup %634  ;;  %v1228_v12 = vmul.f32 0.6931472, %v633_v14  ;;  %v1471_v57 = vsub.f32 1.0, %v923_v6  ;;  %v1488_v39 = vld [vmem:[#allocation38_spill] sm:$0xff]  ;;  %v1489_v14 = vld [vmem:[#allocation39_spill] sm:$0xff] }
  0x7b   :  { %v375_v51 = vmul.f32 %v1469_v48, %v1177_v50  ;;  %v1472_v21 = vsub.f32 1.0, %v932_v15  ;;  %v1473_v11 = vsub.f32 1.0, %v934_v19  ;;  %v637_v41 = vpop.eup %636  ;;  %v1237_v58 = vmul.f32 0.6931472, %v635_v54  ;;  %v1490_v48 = vld [vmem:[#allocation40_spill] sm:$0xff] }
  0x7c   :  { %v376_v26 = vmul.f32 %v1470_v3, %v1181_v40  ;;  %v377_v23 = vmul.f32 %v1471_v57, %v1185_v17  ;;  %v1474_v50 = vsub.f32 1.0, %v951_v45  ;;  %v1475_v40 = vsub.f32 1.0, %v958_v25  ;;  %v639_v6 = vpop.eup %638  ;;  %v1491_v57 = vld [vmem:[#allocation41_spill] sm:$0xff] }
  0x7d   :  { %v378_v32 = vmul.f32 %v1472_v21, %v346_v27  ;;  %v379_v44 = vmul.f32 %v1473_v11, %v347_v60  ;;  %v1476_v52 = vsub.f32 1.0, %v976_v10  ;;  %v1245_v17 = vmul.f32 0.6931472, %v637_v41  ;;  %v641_v45 = vpop.eup %640  ;;  %v1481_v10 = vld [vmem:[#allocation44_spill] sm:$0xff]  ;;  %v1492_v21 = vld [vmem:[#allocation42_spill] sm:$0xff]  ;;  %v1494_v11 = vld [vmem:[#allocation43_spill] sm:$0xff] }
  0x7e   :  { %v380_v63 = vmul.f32 %v1474_v50, %v348_v9  ;;  %v381_v37 = vmul.f32 %v1475_v40, %v349_v56  ;;  %v1477_v15 = vsub.f32 1.0, %v982_v20  ;;  %v1478_v19 = vsub.f32 1.0, %v992_v28  ;;  %v643_v20 = vpop.eup %642  ;;  %v1485_v28 = vld [vmem:[#allocation33_spill] sm:$0xff]  ;;  %v1496_v40 = vld [vmem:[#allocation46_spill] sm:$0xff] }
  0x7f   :  { %v382_v13 = vmul.f32 %v1476_v52, %v350_v46  ;;  %v1479_v30 = vsub.f32 1.0, %v1002_v22  ;;  %v1253_v9 = vmul.f32 0.6931472, %v639_v6  ;;  %v1480_v25 = vsub.f32 1.0, %v1012_v34  ;;  %v1486_v22 = vld [vmem:[#allocation36_spill] sm:$0xff]  ;;  %v645_v34 = vpop.eup %644 }
  0x80   :  { %v383_v27 = vmul.f32 %v1477_v15, %v351_v42  ;;  %v384_v60 = vmul.f32 %v1478_v19, %v352_v49  ;;  %v1482_v46 = vsub.f32 1.0, %v1481_v10  ;;  %v1484_v47 = vsub.f32 1.0, %v1483_v53  ;;  %v1508_v53 = vld [vmem:[#allocation57_spill] sm:$0xff] }
  0x81   :  { %v385_v62 = vmul.f32 %v1479_v30, %v353_v7  ;;  %v386_v56 = vmul.f32 %v1480_v25, %v354_v29  ;;  %v1261_v42 = vmul.f32 0.6931472, %v641_v45  ;;  %v1264_v49 = vadd.f32 %v1485_v28, %v373_v35  ;;  %v647_v35 = vpop.eup %646  ;;  %v1502_v30 = vld [vmem:[#allocation52_spill] sm:$0xff] }
  0x82   :  { %v387_v24 = vmul.f32 %v1482_v46, %v355_v36  ;;  %v388_v8 = vmul.f32 %v1484_v47, %v356_v18  ;;  %v1267_v7 = vadd.f32 %v1486_v22, %v374_v61  ;;  %v1270_v38 = vadd.f32 %v1487_v59, %v375_v51  ;;  %v649_v50 = vpop.eup %648  ;;  %v1512_v59 = vld [vmem:[#allocation16_spill] sm:$0xff] }
  0x83   :  { %v1272_v29 = vmul.f32 0.6931472, %v643_v20  ;;  %v1275_v36 = vadd.f32 %v1488_v39, %v376_v26  ;;  %v1278_v18 = vadd.f32 %v1489_v14, %v377_v23  ;;  %v1281_v3 = vadd.f32 %v1490_v48, %v378_v32  ;;  %v1498_v23 = vld [vmem:[#allocation48_spill] sm:$0xff]  ;;  %v1500_v32 = vld [vmem:[#allocation50_spill] sm:$0xff]  ;;  %v651_v19 = vpop.eup %650 }
  0x84   :  { %v316_v54 = vmul.f32 0.6931472, %v645_v34  ;;  %v1284_v61 = vadd.f32 %v1491_v57, %v379_v44  ;;  %v1287_v51 = vadd.f32 %v1492_v21, %v380_v63  ;;  %v1290_v41 = vadd.f32 %v1494_v11, %v381_v37  ;;  %v1504_v63 = vld [vmem:[#allocation54_spill] sm:$0xff]  ;;  %v1506_v37 = vld [vmem:[#allocation56_spill] sm:$0xff]  ;;  %v653_v46 = vpop.eup %652 }
  0x85   :  { %v318_v26 = vmul.f32 0.6931472, %v647_v35  ;;  %v1293_v52 = vadd.f32 %v1496_v40, %v382_v13  ;;  %v1296_v6 = vadd.f32 %v1498_v23, %v383_v27  ;;  %v1299_v15 = vadd.f32 %v1500_v32, %v384_v60  ;;  %v1510_v27 = vld [vmem:[#allocation14_spill] sm:$0xff]  ;;  %v1511_v60 = vld [vmem:[#allocation15_spill] sm:$0xff]  ;;  %v1515_v48 = vld [vmem:[#allocation20_spill] sm:$0xff] }
  0x86   :  { %1493 = vst [vmem:[#allocation44_spill] sm:$0xff] %v1287_v51  ;;  %1495 = vst [vmem:[#allocation45_spill] sm:$0xff] %v1290_v41  ;;  %v320_v44 = vmul.f32 0.6931472, %v649_v50  ;;  %v1302_v45 = vadd.f32 %v1502_v30, %v385_v62  ;;  %v1305_v25 = vadd.f32 %v1504_v63, %v386_v56  ;;  %v1308_v10 = vadd.f32 %v1506_v37, %v387_v24  ;;  %v1513_v62 = vld [vmem:[#allocation17_spill] sm:$0xff]  ;;  %v1514_v14 = vld [vmem:[#allocation18_spill] sm:$0xff] }
  0x87   :  { %1497 = vst [vmem:[#allocation33_spill] sm:$0xff] %v1293_v52  ;;  %1499 = vst [vmem:[#allocation36_spill] sm:$0xff] %v1296_v6  ;;  %v322_v13 = vmul.f32 0.6931472, %v651_v19  ;;  %v1311_v47 = vadd.f32 %v1508_v53, %v388_v8  ;;  %v427_v20 = vmax.f32 %v1510_v27, 0.0  ;;  %v428_v28 = vmax.f32 %v1511_v60, 0.0 }
  0x88   :  { %1501 = vst [vmem:[#allocation37_spill] sm:$0xff] %v1299_v15  ;;  %1503 = vst [vmem:[#allocation38_spill] sm:$0xff] %v1302_v45  ;;  %v324_v22 = vmul.f32 0.6931472, %v653_v46  ;;  %v429_v34 = vmax.f32 %v1512_v59, 0.0  ;;  %v430_v39 = vmax.f32 %v1513_v62, 0.0 }
  0x89   :  { %1505 = vst [vmem:[#allocation39_spill] sm:$0xff] %v1305_v25  ;;  %1507 = vst [vmem:[#allocation40_spill] sm:$0xff] %v1308_v10  ;;  %v431_v56 = vmax.f32 %v1514_v14, 0.0  ;;  %v432_v35 = vmax.f32 %v1515_v48, 0.0  ;;  %v1516_v24 = vld [vmem:[#allocation25_spill] sm:$0xff]  ;;  %v1517_v21 = vld [vmem:[#allocation28_spill] sm:$0xff] }
  0x8a   :  { %1509 = vst [vmem:[#allocation41_spill] sm:$0xff] %v1311_v47  ;;  %v433_v57 = vmax.f32 %v1516_v24, 0.0  ;;  %v434_v11 = vmax.f32 %v1517_v21, 0.0  ;;  %v1518_v50 = vld [vmem:[#allocation29_spill] sm:$0xff]  ;;  %v1519_v40 = vld [vmem:[#allocation32_spill] sm:$0xff]  ;;  %v1520_v32 = vld [vmem:[#allocation47_spill] sm:$0xff] }
  0x8b   :  { %v435_v8 = vmax.f32 %v1518_v50, 0.0  ;;  %v436_v23 = vmax.f32 %v1519_v40, 0.0  ;;  %v448_v19 = vmul.f32 %v1520_v32, %v1515_v48  ;;  %v1521_v30 = vld [vmem:[#allocation49_spill] sm:$0xff]  ;;  %v1522_v37 = vld [vmem:[#allocation51_spill] sm:$0xff]  ;;  %v1526_v14 = vmax.f32 %v826_v0, 0.0  ;;  %v1529_v32 = vld [vmem:[#allocation22_spill] sm:$0xff] }
  0x8c   :  { %v449_v63 = vmul.f32 %v1521_v30, %v1516_v24  ;;  %v450_v46 = vmul.f32 %v1522_v37, %v1517_v21  ;;  %v1523_v53 = vld [vmem:[#allocation53_spill] sm:$0xff]  ;;  %v1524_v60 = vld [vmem:[#allocation55_spill] sm:$0xff]  ;;  %v1528_v25 = vmax.f32 %v828_v1, 0.0  ;;  %v1530_v24 = vmax.f32 %v830_v2, 0.0  ;;  %v1539_v1 = vld [vmem:[#allocation30_spill] sm:$0xff] }
  0x8d   :  { %v451_v27 = vmul.f32 %v1523_v53, %v1518_v50  ;;  %v452_v59 = vmul.f32 %v1524_v60, %v1519_v40  ;;  %v1525_v62 = vld [vmem:[#allocation19_spill] sm:$0xff]  ;;  %v1527_v10 = vld [vmem:[#allocation21_spill] sm:$0xff]  ;;  %v1534_v50 = vld [vmem:[#allocation24_spill] sm:$0xff]  ;;  %v1535_v53 = vmax.f32 %v834_v4, 0.0  ;;  %v1537_v0 = vmax.f32 %v836_v5, 0.0 }
  0x8e   :  { %v453_v47 = vsub.f32 %v1526_v14, %v1525_v62  ;;  %v454_v48 = vsub.f32 %v1528_v25, %v1527_v10  ;;  %v455_v30 = vsub.f32 %v1530_v24, %v1529_v32  ;;  %v1531_v45 = vld [vmem:[#allocation23_spill] sm:$0xff]  ;;  %v1532_v21 = vld [vmem:[#allocation13_spill] sm:$0xff]  ;;  %v1536_v60 = vld [vmem:[#allocation26_spill] sm:$0xff]  ;;  %v460_v25 = vsub.f32 %v428_v28, %v1539_v1 }
  0x8f   :  { %v1533_v37 = vmax.f32 %v1532_v21, 0.0  ;;  %v457_v40 = vsub.f32 %v1535_v53, %v1534_v50  ;;  %v458_v62 = vsub.f32 %v1537_v0, %v1536_v60  ;;  %v1538_v14 = vld [vmem:[#allocation27_spill] sm:$0xff]  ;;  %v1541_v2 = vld [vmem:[#allocation34_spill] sm:$0xff]  ;;  %v464_v21 = vsub.f32 %v432_v35, %v448_v19 }
  0x90   :  { %v459_v6 = vsub.f32 %v427_v20, %v1538_v14  ;;  %v1540_v10 = vld [vmem:[#allocation31_spill] sm:$0xff]  ;;  %v462_v32 = vsub.f32 %v430_v39, %v1541_v2  ;;  %v467_v51 = vsub.f32 %v435_v8, %v451_v27  ;;  %v468_v4 = vsub.f32 %v436_v23, %v452_v59  ;;  %v1550_v23 = vld [vmem:[#allocation40_spill] sm:$0xff] }
  0x91   :  { %v456_v15 = vsub.f32 %v1533_v37, %v1531_v45  ;;  %v461_v52 = vsub.f32 %v429_v34, %v1540_v10  ;;  %v1542_v24 = vld [vmem:[#allocation35_spill] sm:$0xff]  ;;  %v465_v45 = vsub.f32 %v433_v57, %v449_v63  ;;  %v466_v37 = vsub.f32 %v434_v11, %v450_v46  ;;  %v1551_v19 = vld [vmem:[#allocation41_spill] sm:$0xff] }
  0x92   :  { %v463_v41 = vsub.f32 %v431_v56, %v1542_v24  ;;  %v469_v50 = vadd.f32 %v453_v47, %v1201_v16  ;;  %v470_v5 = vadd.f32 %v454_v48, %v1204_v31  ;;  %v471_v53 = vadd.f32 %v455_v30, %v1207_v55 }
  0x93   :  { %v472_v20 = vadd.f32 %v456_v15, %v1213_v43  ;;  %v473_v28 = vadd.f32 %v457_v40, %v1219_v33  ;;  %v474_v34 = vadd.f32 %v458_v62, %v1228_v12  ;;  %v475_v39 = vadd.f32 %v459_v6, %v1237_v58  ;;  %v1546_v6 = vld [vmem:[#allocation36_spill] sm:$0xff]  ;;  %v1547_v15 = vld [vmem:[#allocation37_spill] sm:$0xff] }
  0x94   :  { %v476_v56 = vadd.f32 %v460_v25, %v1245_v17  ;;  %v477_v35 = vadd.f32 %v461_v52, %v1253_v9  ;;  %v478_v57 = vadd.f32 %v462_v32, %v1261_v42  ;;  %v479_v16 = vadd.f32 %v463_v41, %v1272_v29  ;;  %v1543_v29 = vld [vmem:[#allocation44_spill] sm:$0xff]  ;;  %v1544_v41 = vld [vmem:[#allocation45_spill] sm:$0xff] }
  0x95   :  { %v480_v47 = vadd.f32 %v464_v21, %v316_v54  ;;  %v481_v31 = vadd.f32 %v465_v45, %v318_v26  ;;  %v482_v11 = vadd.f32 %v466_v37, %v320_v44  ;;  %v483_v55 = vadd.f32 %v467_v51, %v322_v13  ;;  %v1545_v51 = vld [vmem:[#allocation33_spill] sm:$0xff]  ;;  %v1548_v44 = vld [vmem:[#allocation38_spill] sm:$0xff]  ;;  %v1549_v13 = vld [vmem:[#allocation39_spill] sm:$0xff] }
  0x96   :  { %v484_v8 = vadd.f32 %v468_v4, %v324_v22  ;;  %v485_v43 = vmul.f32 %v469_v50, %v1264_v49  ;;  %v486_v33 = vmul.f32 %v470_v5, %v1267_v7  ;;  %v487_v12 = vmul.f32 %v471_v53, %v1270_v38 }
  0x97   :  { %v488_v58 = vmul.f32 %v472_v20, %v1275_v36  ;;  %v489_v17 = vmul.f32 %v473_v28, %v1278_v18  ;;  %v490_v9 = vmul.f32 %v474_v34, %v1281_v3  ;;  %v491_v42 = vmul.f32 %v475_v39, %v1284_v61 }
  0x98   :  { %v492_v54 = vmul.f32 %v476_v56, %v1543_v29  ;;  %v493_v26 = vmul.f32 %v477_v35, %v1544_v41  ;;  %v494_v52 = vmul.f32 %v478_v57, %v1545_v51  ;;  %v495_v49 = vmul.f32 %v479_v16, %v1546_v6 }
  0x99   :  { %v496_v7 = vmul.f32 %v480_v47, %v1547_v15  ;;  %v497_v38 = vmul.f32 %v481_v31, %v1548_v44  ;;  %v498_v36 = vmul.f32 %v482_v11, %v1549_v13  ;;  %v505_v22 = vadd.f32 %v489_v17, %v485_v43 }
  0x9a   :  { %v508_v18 = vadd.f32 %v490_v9, %v486_v33  ;;  %v499_v3 = vmul.f32 %v483_v55, %v1550_v23  ;;  %v500_v61 = vmul.f32 %v484_v8, %v1551_v19  ;;  %v511_v63 = vadd.f32 %v491_v42, %v487_v12 }
  0x9b   :  { %v514_v46 = vadd.f32 %v492_v54, %v488_v58  ;;  %v506_v27 = vadd.f32 %v505_v22, %v493_v26 }
  0x9c   :  { %v509_v59 = vadd.f32 %v508_v18, %v494_v52  ;;  %v512_v48 = vadd.f32 %v511_v63, %v495_v49 }
  0x9d   :  { %v515_v30 = vadd.f32 %v514_v46, %v496_v7  ;;  %v507_v40 = vadd.f32 %v506_v27, %v497_v38 }
  0x9e   :  { %v510_v60 = vadd.f32 %v509_v59, %v498_v36  ;;  %v513_v0 = vadd.f32 %v512_v48, %v499_v3 }
  0x9f   :  { %v516_v62 = vadd.f32 %v515_v30, %v500_v61  ;;  %532 = vst [vmem:[#allocation9] sm:$0xff] %v507_v40 }
  0xa0   :  { %533 = vst [vmem:[#allocation9 + $0x8] sm:$0xff] %v510_v60  ;;  %534 = vst [vmem:[#allocation9 + $0x10] sm:$0xff] %v513_v0 }
  0xa1   :  { %535 = vst [vmem:[#allocation9 + $0x18] sm:$0xff] %v516_v62 }
  0xa2   :  { %731 = shalt.err (!%p728_p0)
}
  0xa3   :  { %s732_s25 = scalar_lea.hbm %s1398_s3, 512 }
  0xa4   :  { %p733_p1 = scmp.ne.s32.totalorder %s1398_s3, %s732_s25  ;;  %p736_p2 = scmp.lt.u32.totalorder %s732_s25, %s1398_s3 }
  0xa6   :  { %p738_p3 = pnand %p736_p2, %p733_p1 }
  0xa8   :  { %741 = shalt.err (!%p738_p3)
}
  0xa9   :  { %545 = dma.vmem_to_hbm [thread:$0]  %s543_s21, 512, %s1398_s3, [#allocation5]  }
  0xaa   :  { %746 = dma.done.wait [#allocation5], 512  }
  0xab   :  { %747 = vsyncadd [#allocation5], 4294966784 }
  0xac   :  { %549 = vsyncpa [#allocation4], 1 }
  0xad   :  { %550 = vsyncpa [#allocation7], 1 }
  0xae   :  { %551 = vsyncpa [#allocation5], 1 }

</bundles_post_ra>
